<compile_context>
chip_gen: v6e
topology: v6e:2x2x1
jax: 0.10.0
libtpu: 0.0.40
codegen_flags: <defaults>
</compile_context>

<pallas_src>
import functools

import jax
import jax.numpy as jnp
import numpy as np
from jax import lax
from jax.experimental import pallas as pl
from jax.experimental.pallas import tpu as pltpu

LN_EPS = 1e-5  # nn.LayerNorm default eps


def zoneout_lstm_seq_kernel(x_ref, w_hh_ref, w_ih_ref, h0_ref, c0_ref,
                            gamma_ref, beta_ref,
                            h_seq_ref, c_seq_ref,
                            h_scr, c_scr, *, hidden_size):
    H = hidden_size
    t = pl.program_id(0)

    # Initialize the carried state on the first grid step.
    @pl.when(t == 0)
    def _():
        h_scr[...] = h0_ref[...].astype(jnp.float32)
        c_scr[...] = c0_ref[...].astype(jnp.float32)

    h = h_scr[...]                       # (B, H) f32, VMEM-resident carry
    c = c_scr[...]                       # (B, H) f32

    # Two MXU matmuls (no wrapper-side concat); f32 accumulation.
    pre = jnp.dot(h.astype(w_hh_ref.dtype), w_hh_ref[...],
                  preferred_element_type=jnp.float32)
    pre = pre + jnp.dot(x_ref[...].astype(w_ih_ref.dtype), w_ih_ref[...],
                        preferred_element_type=jnp.float32)

    # Load LN params once per step (tiny, VMEM-resident across the grid).
    gam = gamma_ref[...]                 # (5, H)
    bet = beta_ref[...]                  # (5, H)

    def ln(v, k):
        mu = jnp.mean(v, axis=-1, keepdims=True)
        var = jnp.mean((v - mu) * (v - mu), axis=-1, keepdims=True)
        return (v - mu) * lax.rsqrt(var + LN_EPS) * gam[k:k + 1, :] + bet[k:k + 1, :]

    # Gate slices are exact 128-lane columns (H == 128k) -> no XLU shuffles.
    f = ln(pre[:, 0 * H:1 * H], 0)
    i = ln(pre[:, 1 * H:2 * H], 1)
    o = ln(pre[:, 2 * H:3 * H], 2)
    g = ln(pre[:, 3 * H:4 * H], 3)

    c1 = jax.nn.sigmoid(f) * c + jax.nn.sigmoid(i) * jnp.tanh(g)
    c1 = ln(c1, 4)
    h1 = jax.nn.sigmoid(o) * jnp.tanh(c1)

    # Carry state in VMEM; stream per-step outputs.
    h_scr[...] = h1
    c_scr[...] = c1
    h_seq_ref[...] = h1.astype(h_seq_ref.dtype)
    c_seq_ref[...] = c1.astype(c_seq_ref.dtype)


def zoneout_lstm_sequence(x_seq, h0, c0, w_hh, w_ih, gammas, betas):
    """Run T eval-mode ZoneOutLSTMCell steps in one fused pallas_call.

    x_seq: (T, B, input_size);  h0, c0: (B, H)
    w_hh: (H, 4H);  w_ih: (input_size, 4H);  gammas/betas: (5, H)
    Returns (h_seq, c_seq), each (T, B, H).
    """
    T, B, I = x_seq.shape
    H = h0.shape[1]

    kernel = functools.partial(zoneout_lstm_seq_kernel, hidden_size=H)
    const2 = lambda t: (0, 0)  # weights / LN params / init state: DMA once

    grid_spec = pltpu.PrefetchScalarGridSpec(
        num_scalar_prefetch=0,
        grid=(T,),
        in_specs=[
            pl.BlockSpec((None, B, I), lambda t: (t, 0, 0)),   # x_t
            pl.BlockSpec((H, 4 * H), const2),                  # w_hh (resident)
            pl.BlockSpec((I, 4 * H), const2),                  # w_ih (resident)
            pl.BlockSpec((B, H), const2),                      # h0
            pl.BlockSpec((B, H), const2),                      # c0
            pl.BlockSpec((5, H), const2),                      # gammas
            pl.BlockSpec((5, H), const2),                      # betas
        ],
        out_specs=[
            pl.BlockSpec((None, B, H), lambda t: (t, 0, 0)),   # h_t
            pl.BlockSpec((None, B, H), lambda t: (t, 0, 0)),   # c_t
        ],
        scratch_shapes=[
            pltpu.VMEM((B, H), jnp.float32),   # carried h
            pltpu.VMEM((B, H), jnp.float32),   # carried c
        ],
    )

    h_seq, c_seq = pl.pallas_call(
        kernel,
        grid_spec=grid_spec,
        out_shape=(jax.ShapeDtypeStruct((T, B, H), x_seq.dtype),
                   jax.ShapeDtypeStruct((T, B, H), x_seq.dtype)),
        compiler_params=pltpu.CompilerParams(
            dimension_semantics=("arbitrary",)),   # sequential recurrence
    )(x_seq, w_hh, w_ih, h0, c0, gammas, betas)
    return h_seq, c_seq


def zoneout_lstm_cell(x, h0, c0, w_hh, w_ih, gammas, betas):
    """Single eval-mode step (matches the module's forward). Returns (h1, c1)."""
    h_seq, c_seq = zoneout_lstm_sequence(x[None], h0, c0, w_hh, w_ih, gammas, betas)
    return h_seq[0], c_seq[0]


# ----------------------------- plain-JAX reference -----------------------------

def _reference_sequence(x_seq, h0, c0, w_hh, w_ih, gammas, betas):
    H = h0.shape[1]

    def ln(v, k):
        mu = jnp.mean(v, axis=-1, keepdims=True)
        var = jnp.mean((v - mu) ** 2, axis=-1, keepdims=True)
        return (v - mu) * lax.rsqrt(var + LN_EPS) * gammas[k][None, :] + betas[k][None, :]

    def step(carry, x):
        h, c = carry
        pre = h @ w_hh + x @ w_ih          # == concat((h, x)) @ combined_weights
        f, i, o, g = [pre[:, k * H:(k + 1) * H] for k in range(4)]
        f, i, o, g = ln(f, 0), ln(i, 1), ln(o, 2), ln(g, 3)
        c1 = jax.nn.sigmoid(f) * c + jax.nn.sigmoid(i) * jnp.tanh(g)
        c1 = ln(c1, 4)
        h1 = jax.nn.sigmoid(o) * jnp.tanh(c1)
        return (h1, c1), (h1, c1)

    _, (h_seq, c_seq) = lax.scan(step, (h0, c0), x_seq)
    return h_seq, c_seq


# ----------------------------- param construction -----------------------------

def _orthogonal_rows(key, rows, cols, dtype=jnp.float32):
    """Deterministic orthogonal init (orthonormal rows), like init.orthogonal_."""
    a = jax.random.normal(key, (cols, rows), dtype=jnp.float32)
    q, r = jnp.linalg.qr(a)                      # q: (cols, rows), orthonormal cols
    q = q * jnp.sign(jnp.diag(r))[None, :]       # sign fix (as torch does)
    return q.T.astype(dtype)                     # (rows, cols), orthonormal rows


def make_params(input_size, hidden_size, key):
    # weight_hh = eye(H) tiled 4x along columns -> (H, 4H)
    w_hh = jnp.tile(jnp.eye(hidden_size, dtype=jnp.float32), (1, 4))
    # weight_ih = orthogonal (input_size, 4H)
    w_ih = _orthogonal_rows(key, input_size, 4 * hidden_size)
    # LayerNorm params at default init (gamma=1, beta=0) for f, i, o, g, c.
    gammas = jnp.ones((5, hidden_size), jnp.float32)
    betas = jnp.zeros((5, hidden_size), jnp.float32)
    return w_hh, w_ih, gammas, betas


if __name__ == "__main__":
    T = 16
    batch = 8            # raise M (stack sequences) for real MXU utilization
    input_size = 64
    hidden_size = 128    # multiple of 128 keeps gate slices lane-aligned

    root = jax.random.PRNGKey(0)
    k_w, k_x, k_h, k_c = jax.random.split(root, 4)

    w_hh, w_ih, gammas, betas = make_params(input_size, hidden_size, k_w)

    x_seq = jax.random.normal(k_x, (T, batch, input_size), jnp.float32)
    h0 = jax.random.normal(k_h, (batch, hidden_size), jnp.float32)
    c0 = jax.random.normal(k_c, (batch, hidden_size), jnp.float32)

    # Fused T-step recurrence (the hot path).
    h_seq, c_seq = jax.jit(zoneout_lstm_sequence)(
        x_seq, h0, c0, w_hh, w_ih, gammas, betas)
    jax.block_until_ready((h_seq, c_seq))

    h_ref, c_ref = jax.jit(_reference_sequence)(
        x_seq, h0, c0, w_hh, w_ih, gammas, betas)
    jax.block_until_ready((h_ref, c_ref))

    np.testing.assert_allclose(np.asarray(h_seq), np.asarray(h_ref),
                               atol=5e-4, rtol=5e-4)
    np.testing.assert_allclose(np.asarray(c_seq), np.asarray(c_ref),
                               atol=5e-4, rtol=5e-4)

    # Single-step call (exactly the module's forward signature behaviour).
    h1, c1 = jax.jit(zoneout_lstm_cell)(x_seq[0], h0, c0, w_hh, w_ih, gammas, betas)
    jax.block_until_ready((h1, c1))
    np.testing.assert_allclose(np.asarray(h1), np.asarray(h_ref[0]),
                               atol=5e-4, rtol=5e-4)
    np.testing.assert_allclose(np.asarray(c1), np.asarray(c_ref[0]),
                               atol=5e-4, rtol=5e-4)

    print("KERNEL_OK")
</pallas_src>

<mosaic_0001>
module attributes {stable_mosaic.version = 11 : i64} {
  func.func @zoneout_lstm_seq_kernel(%arg0: i32, %arg1: memref<1x8x64xf32, #tpu.memory_space<vmem>>, %arg2: memref<128x512xf32, #tpu.memory_space<vmem>>, %arg3: memref<64x512xf32, #tpu.memory_space<vmem>>, %arg4: memref<8x128xf32, #tpu.memory_space<vmem>>, %arg5: memref<8x128xf32, #tpu.memory_space<vmem>>, %arg6: memref<5x128xf32, #tpu.memory_space<vmem>>, %arg7: memref<5x128xf32, #tpu.memory_space<vmem>>, %arg8: memref<1x8x128xf32, #tpu.memory_space<vmem>>, %arg9: memref<1x8x128xf32, #tpu.memory_space<vmem>>, %arg10: memref<8x128xf32, #tpu.memory_space<vmem>>, %arg11: memref<8x128xf32, #tpu.memory_space<vmem>>) attributes {dimension_semantics = [#tpu.dimension_semantics<arbitrary>], iteration_bounds = array<i64: 16>, scalar_prefetch = 0 : i64, scratch_operands = 2 : i64, tpu.core_type = #tpu.core_type<tc>, window_params = [{transform_indices = @transform_0, window_bounds = array<i64: 1, 8, 64>}, {pipeline_mode = #tpu.pipeline_mode<synchronous>, transform_indices = @transform_1, window_bounds = array<i64: 128, 512>}, {pipeline_mode = #tpu.pipeline_mode<synchronous>, transform_indices = @transform_2, window_bounds = array<i64: 64, 512>}, {pipeline_mode = #tpu.pipeline_mode<synchronous>, transform_indices = @transform_3, window_bounds = array<i64: 8, 128>}, {pipeline_mode = #tpu.pipeline_mode<synchronous>, transform_indices = @transform_4, window_bounds = array<i64: 8, 128>}, {pipeline_mode = #tpu.pipeline_mode<synchronous>, transform_indices = @transform_5, window_bounds = array<i64: 5, 128>}, {pipeline_mode = #tpu.pipeline_mode<synchronous>, transform_indices = @transform_6, window_bounds = array<i64: 5, 128>}, {transform_indices = @transform_7, window_bounds = array<i64: 1, 8, 128>}, {transform_indices = @transform_8, window_bounds = array<i64: 1, 8, 128>}]} {
    %c0_i32 = arith.constant 0 : i32
    %0 = arith.cmpi eq, %arg0, %c0_i32 : i32
    %1 = arith.extui %0 : i1 to i32
    %c0_i32_0 = arith.constant 0 : i32
    %2 = arith.cmpi ne, %1, %c0_i32_0 : i32
    scf.if %2 {
      %c0_54 = arith.constant 0 : index
      %c0_55 = arith.constant 0 : index
      %177 = vector.load %arg4[%c0_54, %c0_55] : memref<8x128xf32, #tpu.memory_space<vmem>>, vector<8x128xf32>
      %c0_56 = arith.constant 0 : index
      %c0_57 = arith.constant 0 : index
      %178 = vector.load %arg10[%c0_56, %c0_57] : memref<8x128xf32, #tpu.memory_space<vmem>>, vector<8x128xf32>
      tpu.vector_store %arg10[%c0_56, %c0_57], %177 {strides = array<i32>} : memref<8x128xf32, #tpu.memory_space<vmem>>, vector<8x128xf32>,
      %c0_58 = arith.constant 0 : index
      %c0_59 = arith.constant 0 : index
      %179 = vector.load %arg5[%c0_58, %c0_59] : memref<8x128xf32, #tpu.memory_space<vmem>>, vector<8x128xf32>
      %c0_60 = arith.constant 0 : index
      %c0_61 = arith.constant 0 : index
      %180 = vector.load %arg11[%c0_60, %c0_61] : memref<8x128xf32, #tpu.memory_space<vmem>>, vector<8x128xf32>
      tpu.vector_store %arg11[%c0_60, %c0_61], %179 {strides = array<i32>} : memref<8x128xf32, #tpu.memory_space<vmem>>, vector<8x128xf32>,
    } else {
    }
    %c0 = arith.constant 0 : index
    %c0_1 = arith.constant 0 : index
    %3 = vector.load %arg10[%c0, %c0_1] : memref<8x128xf32, #tpu.memory_space<vmem>>, vector<8x128xf32>
    %c0_2 = arith.constant 0 : index
    %c0_3 = arith.constant 0 : index
    %4 = vector.load %arg11[%c0_2, %c0_3] : memref<8x128xf32, #tpu.memory_space<vmem>>, vector<8x128xf32>
    %c0_4 = arith.constant 0 : index
    %c0_5 = arith.constant 0 : index
    %5 = vector.load %arg2[%c0_4, %c0_5] : memref<128x512xf32, #tpu.memory_space<vmem>>, vector<128x512xf32>
    %cst = arith.constant dense<0.000000e+00> : vector<8x512xf32>
    %6 = tpu.matmul %3, %5, %cst {dimension_numbers = #tpu.dot_dimension_numbers<[1], [0], [0], [1], [0, 0, 1, 1], [], []>} : vector<8x128xf32>, vector<128x512xf32>, vector<8x512xf32> -> vector<8x512xf32>
    %c0_6 = arith.constant 0 : index
    %c0_7 = arith.constant 0 : index
    %c0_8 = arith.constant 0 : index
    %7 = vector.load %arg1[%c0_6, %c0_7, %c0_8] : memref<1x8x64xf32, #tpu.memory_space<vmem>>, vector<1x8x64xf32>
    %8 = vector.shape_cast %7 : vector<1x8x64xf32> to vector<8x64xf32>
    %c0_9 = arith.constant 0 : index
    %c0_10 = arith.constant 0 : index
    %9 = vector.load %arg3[%c0_9, %c0_10] : memref<64x512xf32, #tpu.memory_space<vmem>>, vector<64x512xf32>
    %cst_11 = arith.constant dense<0.000000e+00> : vector<8x512xf32>
    %10 = tpu.matmul %8, %9, %cst_11 {dimension_numbers = #tpu.dot_dimension_numbers<[1], [0], [0], [1], [0, 0, 1, 1], [], []>} : vector<8x64xf32>, vector<64x512xf32>, vector<8x512xf32> -> vector<8x512xf32>
    %11 = arith.addf %6, %10 : vector<8x512xf32>
    %c0_12 = arith.constant 0 : index
    %c0_13 = arith.constant 0 : index
    %12 = vector.load %arg6[%c0_12, %c0_13] : memref<5x128xf32, #tpu.memory_space<vmem>>, vector<5x128xf32>
    %c0_14 = arith.constant 0 : index
    %c0_15 = arith.constant 0 : index
    %13 = vector.load %arg7[%c0_14, %c0_15] : memref<5x128xf32, #tpu.memory_space<vmem>>, vector<5x128xf32>
    %14 = vector.extract_strided_slice %11 {offsets = [0, 0], sizes = [8, 128], strides = [1, 1]} : vector<8x512xf32> to vector<8x128xf32>
    %cst_16 = arith.constant dense<0.000000e+00> : vector<8xf32>
    %15 = vector.multi_reduction <add>, %14, %cst_16 [1] : vector<8x128xf32> to vector<8xf32>
    %16 = vector.shape_cast %15 : vector<8xf32> to vector<8x1xf32>
    %cst_17 = arith.constant 1.280000e+02 : f32
    %17 = vector.broadcast %cst_17 : f32 to vector<8x1xf32>
    %18 = arith.divf %16, %17 : vector<8x1xf32>
    %19 = vector.broadcast %18 : vector<8x1xf32> to vector<8x128xf32>
    %20 = arith.subf %14, %19 : vector<8x128xf32>
    %21 = vector.broadcast %18 : vector<8x1xf32> to vector<8x128xf32>
    %22 = arith.subf %14, %21 : vector<8x128xf32>
    %23 = arith.mulf %20, %22 : vector<8x128xf32>
    %cst_18 = arith.constant dense<0.000000e+00> : vector<8xf32>
    %24 = vector.multi_reduction <add>, %23, %cst_18 [1] : vector<8x128xf32> to vector<8xf32>
    %25 = vector.shape_cast %24 : vector<8xf32> to vector<8x1xf32>
    %cst_19 = arith.constant 1.280000e+02 : f32
    %26 = vector.broadcast %cst_19 : f32 to vector<8x1xf32>
    %27 = arith.divf %25, %26 : vector<8x1xf32>
    %28 = vector.broadcast %18 : vector<8x1xf32> to vector<8x128xf32>
    %29 = arith.subf %14, %28 : vector<8x128xf32>
    %cst_20 = arith.constant 9.99999974E-6 : f32
    %30 = vector.broadcast %cst_20 : f32 to vector<8x1xf32>
    %31 = arith.addf %27, %30 : vector<8x1xf32>
    %32 = math.rsqrt %31 : vector<8x1xf32>
    %33 = vector.broadcast %32 : vector<8x1xf32> to vector<8x128xf32>
    %34 = arith.mulf %29, %33 : vector<8x128xf32>
    %35 = vector.extract_strided_slice %12 {offsets = [0, 0], sizes = [1, 128], strides = [1, 1]} : vector<5x128xf32> to vector<1x128xf32>
    %36 = vector.broadcast %35 : vector<1x128xf32> to vector<8x128xf32>
    %37 = arith.mulf %34, %36 : vector<8x128xf32>
    %38 = vector.extract_strided_slice %13 {offsets = [0, 0], sizes = [1, 128], strides = [1, 1]} : vector<5x128xf32> to vector<1x128xf32>
    %39 = vector.broadcast %38 : vector<1x128xf32> to vector<8x128xf32>
    %40 = arith.addf %37, %39 : vector<8x128xf32>
    %41 = vector.extract_strided_slice %11 {offsets = [0, 128], sizes = [8, 128], strides = [1, 1]} : vector<8x512xf32> to vector<8x128xf32>
    %cst_21 = arith.constant dense<0.000000e+00> : vector<8xf32>
    %42 = vector.multi_reduction <add>, %41, %cst_21 [1] : vector<8x128xf32> to vector<8xf32>
    %43 = vector.shape_cast %42 : vector<8xf32> to vector<8x1xf32>
    %cst_22 = arith.constant 1.280000e+02 : f32
    %44 = vector.broadcast %cst_22 : f32 to vector<8x1xf32>
    %45 = arith.divf %43, %44 : vector<8x1xf32>
    %46 = vector.broadcast %45 : vector<8x1xf32> to vector<8x128xf32>
    %47 = arith.subf %41, %46 : vector<8x128xf32>
    %48 = vector.broadcast %45 : vector<8x1xf32> to vector<8x128xf32>
    %49 = arith.subf %41, %48 : vector<8x128xf32>
    %50 = arith.mulf %47, %49 : vector<8x128xf32>
    %cst_23 = arith.constant dense<0.000000e+00> : vector<8xf32>
    %51 = vector.multi_reduction <add>, %50, %cst_23 [1] : vector<8x128xf32> to vector<8xf32>
    %52 = vector.shape_cast %51 : vector<8xf32> to vector<8x1xf32>
    %cst_24 = arith.constant 1.280000e+02 : f32
    %53 = vector.broadcast %cst_24 : f32 to vector<8x1xf32>
    %54 = arith.divf %52, %53 : vector<8x1xf32>
    %55 = vector.broadcast %45 : vector<8x1xf32> to vector<8x128xf32>
    %56 = arith.subf %41, %55 : vector<8x128xf32>
    %cst_25 = arith.constant 9.99999974E-6 : f32
    %57 = vector.broadcast %cst_25 : f32 to vector<8x1xf32>
    %58 = arith.addf %54, %57 : vector<8x1xf32>
    %59 = math.rsqrt %58 : vector<8x1xf32>
    %60 = vector.broadcast %59 : vector<8x1xf32> to vector<8x128xf32>
    %61 = arith.mulf %56, %60 : vector<8x128xf32>
    %62 = vector.extract_strided_slice %12 {offsets = [1, 0], sizes = [1, 128], strides = [1, 1]} : vector<5x128xf32> to vector<1x128xf32>
    %63 = vector.broadcast %62 : vector<1x128xf32> to vector<8x128xf32>
    %64 = arith.mulf %61, %63 : vector<8x128xf32>
    %65 = vector.extract_strided_slice %13 {offsets = [1, 0], sizes = [1, 128], strides = [1, 1]} : vector<5x128xf32> to vector<1x128xf32>
    %66 = vector.broadcast %65 : vector<1x128xf32> to vector<8x128xf32>
    %67 = arith.addf %64, %66 : vector<8x128xf32>
    %68 = vector.extract_strided_slice %11 {offsets = [0, 256], sizes = [8, 128], strides = [1, 1]} : vector<8x512xf32> to vector<8x128xf32>
    %cst_26 = arith.constant dense<0.000000e+00> : vector<8xf32>
    %69 = vector.multi_reduction <add>, %68, %cst_26 [1] : vector<8x128xf32> to vector<8xf32>
    %70 = vector.shape_cast %69 : vector<8xf32> to vector<8x1xf32>
    %cst_27 = arith.constant 1.280000e+02 : f32
    %71 = vector.broadcast %cst_27 : f32 to vector<8x1xf32>
    %72 = arith.divf %70, %71 : vector<8x1xf32>
    %73 = vector.broadcast %72 : vector<8x1xf32> to vector<8x128xf32>
    %74 = arith.subf %68, %73 : vector<8x128xf32>
    %75 = vector.broadcast %72 : vector<8x1xf32> to vector<8x128xf32>
    %76 = arith.subf %68, %75 : vector<8x128xf32>
    %77 = arith.mulf %74, %76 : vector<8x128xf32>
    %cst_28 = arith.constant dense<0.000000e+00> : vector<8xf32>
    %78 = vector.multi_reduction <add>, %77, %cst_28 [1] : vector<8x128xf32> to vector<8xf32>
    %79 = vector.shape_cast %78 : vector<8xf32> to vector<8x1xf32>
    %cst_29 = arith.constant 1.280000e+02 : f32
    %80 = vector.broadcast %cst_29 : f32 to vector<8x1xf32>
    %81 = arith.divf %79, %80 : vector<8x1xf32>
    %82 = vector.broadcast %72 : vector<8x1xf32> to vector<8x128xf32>
    %83 = arith.subf %68, %82 : vector<8x128xf32>
    %cst_30 = arith.constant 9.99999974E-6 : f32
    %84 = vector.broadcast %cst_30 : f32 to vector<8x1xf32>
    %85 = arith.addf %81, %84 : vector<8x1xf32>
    %86 = math.rsqrt %85 : vector<8x1xf32>
    %87 = vector.broadcast %86 : vector<8x1xf32> to vector<8x128xf32>
    %88 = arith.mulf %83, %87 : vector<8x128xf32>
    %89 = vector.extract_strided_slice %12 {offsets = [2, 0], sizes = [1, 128], strides = [1, 1]} : vector<5x128xf32> to vector<1x128xf32>
    %90 = vector.broadcast %89 : vector<1x128xf32> to vector<8x128xf32>
    %91 = arith.mulf %88, %90 : vector<8x128xf32>
    %92 = vector.extract_strided_slice %13 {offsets = [2, 0], sizes = [1, 128], strides = [1, 1]} : vector<5x128xf32> to vector<1x128xf32>
    %93 = vector.broadcast %92 : vector<1x128xf32> to vector<8x128xf32>
    %94 = arith.addf %91, %93 : vector<8x128xf32>
    %95 = vector.extract_strided_slice %11 {offsets = [0, 384], sizes = [8, 128], strides = [1, 1]} : vector<8x512xf32> to vector<8x128xf32>
    %cst_31 = arith.constant dense<0.000000e+00> : vector<8xf32>
    %96 = vector.multi_reduction <add>, %95, %cst_31 [1] : vector<8x128xf32> to vector<8xf32>
    %97 = vector.shape_cast %96 : vector<8xf32> to vector<8x1xf32>
    %cst_32 = arith.constant 1.280000e+02 : f32
    %98 = vector.broadcast %cst_32 : f32 to vector<8x1xf32>
    %99 = arith.divf %97, %98 : vector<8x1xf32>
    %100 = vector.broadcast %99 : vector<8x1xf32> to vector<8x128xf32>
    %101 = arith.subf %95, %100 : vector<8x128xf32>
    %102 = vector.broadcast %99 : vector<8x1xf32> to vector<8x128xf32>
    %103 = arith.subf %95, %102 : vector<8x128xf32>
    %104 = arith.mulf %101, %103 : vector<8x128xf32>
    %cst_33 = arith.constant dense<0.000000e+00> : vector<8xf32>
    %105 = vector.multi_reduction <add>, %104, %cst_33 [1] : vector<8x128xf32> to vector<8xf32>
    %106 = vector.shape_cast %105 : vector<8xf32> to vector<8x1xf32>
    %cst_34 = arith.constant 1.280000e+02 : f32
    %107 = vector.broadcast %cst_34 : f32 to vector<8x1xf32>
    %108 = arith.divf %106, %107 : vector<8x1xf32>
    %109 = vector.broadcast %99 : vector<8x1xf32> to vector<8x128xf32>
    %110 = arith.subf %95, %109 : vector<8x128xf32>
    %cst_35 = arith.constant 9.99999974E-6 : f32
    %111 = vector.broadcast %cst_35 : f32 to vector<8x1xf32>
    %112 = arith.addf %108, %111 : vector<8x1xf32>
    %113 = math.rsqrt %112 : vector<8x1xf32>
    %114 = vector.broadcast %113 : vector<8x1xf32> to vector<8x128xf32>
    %115 = arith.mulf %110, %114 : vector<8x128xf32>
    %116 = vector.extract_strided_slice %12 {offsets = [3, 0], sizes = [1, 128], strides = [1, 1]} : vector<5x128xf32> to vector<1x128xf32>
    %117 = vector.broadcast %116 : vector<1x128xf32> to vector<8x128xf32>
    %118 = arith.mulf %115, %117 : vector<8x128xf32>
    %119 = vector.extract_strided_slice %13 {offsets = [3, 0], sizes = [1, 128], strides = [1, 1]} : vector<5x128xf32> to vector<1x128xf32>
    %120 = vector.broadcast %119 : vector<1x128xf32> to vector<8x128xf32>
    %121 = arith.addf %118, %120 : vector<8x128xf32>
    %122 = arith.negf %40 : vector<8x128xf32>
    %123 = math.exp %122 : vector<8x128xf32>
    %cst_36 = arith.constant 1.000000e+00 : f32
    %124 = vector.broadcast %cst_36 : f32 to vector<8x128xf32>
    %125 = arith.addf %124, %123 : vector<8x128xf32>
    %126 = arith.divf %124, %125 : vector<8x128xf32>
    %127 = arith.mulf %126, %4 : vector<8x128xf32>
    %128 = arith.negf %67 : vector<8x128xf32>
    %129 = math.exp %128 : vector<8x128xf32>
    %cst_37 = arith.constant 1.000000e+00 : f32
    %130 = vector.broadcast %cst_37 : f32 to vector<8x128xf32>
    %131 = arith.addf %130, %129 : vector<8x128xf32>
    %132 = arith.divf %130, %131 : vector<8x128xf32>
    %133 = math.tanh %121 : vector<8x128xf32>
    %134 = arith.mulf %132, %133 : vector<8x128xf32>
    %135 = arith.addf %127, %134 : vector<8x128xf32>
    %cst_38 = arith.constant dense<0.000000e+00> : vector<8xf32>
    %136 = vector.multi_reduction <add>, %135, %cst_38 [1] : vector<8x128xf32> to vector<8xf32>
    %137 = vector.shape_cast %136 : vector<8xf32> to vector<8x1xf32>
    %cst_39 = arith.constant 1.280000e+02 : f32
    %138 = vector.broadcast %cst_39 : f32 to vector<8x1xf32>
    %139 = arith.divf %137, %138 : vector<8x1xf32>
    %140 = vector.broadcast %139 : vector<8x1xf32> to vector<8x128xf32>
    %141 = arith.subf %135, %140 : vector<8x128xf32>
    %142 = vector.broadcast %139 : vector<8x1xf32> to vector<8x128xf32>
    %143 = arith.subf %135, %142 : vector<8x128xf32>
    %144 = arith.mulf %141, %143 : vector<8x128xf32>
    %cst_40 = arith.constant dense<0.000000e+00> : vector<8xf32>
    %145 = vector.multi_reduction <add>, %144, %cst_40 [1] : vector<8x128xf32> to vector<8xf32>
    %146 = vector.shape_cast %145 : vector<8xf32> to vector<8x1xf32>
    %cst_41 = arith.constant 1.280000e+02 : f32
    %147 = vector.broadcast %cst_41 : f32 to vector<8x1xf32>
    %148 = arith.divf %146, %147 : vector<8x1xf32>
    %149 = vector.broadcast %139 : vector<8x1xf32> to vector<8x128xf32>
    %150 = arith.subf %135, %149 : vector<8x128xf32>
    %cst_42 = arith.constant 9.99999974E-6 : f32
    %151 = vector.broadcast %cst_42 : f32 to vector<8x1xf32>
    %152 = arith.addf %148, %151 : vector<8x1xf32>
    %153 = math.rsqrt %152 : vector<8x1xf32>
    %154 = vector.broadcast %153 : vector<8x1xf32> to vector<8x128xf32>
    %155 = arith.mulf %150, %154 : vector<8x128xf32>
    %156 = vector.extract_strided_slice %12 {offsets = [4, 0], sizes = [1, 128], strides = [1, 1]} : vector<5x128xf32> to vector<1x128xf32>
    %157 = vector.broadcast %156 : vector<1x128xf32> to vector<8x128xf32>
    %158 = arith.mulf %155, %157 : vector<8x128xf32>
    %159 = vector.extract_strided_slice %13 {offsets = [4, 0], sizes = [1, 128], strides = [1, 1]} : vector<5x128xf32> to vector<1x128xf32>
    %160 = vector.broadcast %159 : vector<1x128xf32> to vector<8x128xf32>
    %161 = arith.addf %158, %160 : vector<8x128xf32>
    %162 = arith.negf %94 : vector<8x128xf32>
    %163 = math.exp %162 : vector<8x128xf32>
    %cst_43 = arith.constant 1.000000e+00 : f32
    %164 = vector.broadcast %cst_43 : f32 to vector<8x128xf32>
    %165 = arith.addf %164, %163 : vector<8x128xf32>
    %166 = arith.divf %164, %165 : vector<8x128xf32>
    %167 = math.tanh %161 : vector<8x128xf32>
    %168 = arith.mulf %166, %167 : vector<8x128xf32>
    %c0_44 = arith.constant 0 : index
    %c0_45 = arith.constant 0 : index
    %169 = vector.load %arg10[%c0_44, %c0_45] : memref<8x128xf32, #tpu.memory_space<vmem>>, vector<8x128xf32>
    tpu.vector_store %arg10[%c0_44, %c0_45], %168 {strides = array<i32>} : memref<8x128xf32, #tpu.memory_space<vmem>>, vector<8x128xf32>,
    %c0_46 = arith.constant 0 : index
    %c0_47 = arith.constant 0 : index
    %170 = vector.load %arg11[%c0_46, %c0_47] : memref<8x128xf32, #tpu.memory_space<vmem>>, vector<8x128xf32>
    tpu.vector_store %arg11[%c0_46, %c0_47], %161 {strides = array<i32>} : memref<8x128xf32, #tpu.memory_space<vmem>>, vector<8x128xf32>,
    %c0_48 = arith.constant 0 : index
    %c0_49 = arith.constant 0 : index
    %c0_50 = arith.constant 0 : index
    %171 = vector.load %arg8[%c0_48, %c0_49, %c0_50] : memref<1x8x128xf32, #tpu.memory_space<vmem>>, vector<1x8x128xf32>
    %172 = vector.shape_cast %171 : vector<1x8x128xf32> to vector<8x128xf32>
    %173 = vector.shape_cast %168 : vector<8x128xf32> to vector<1x8x128xf32>
    tpu.vector_store %arg8[%c0_48, %c0_49, %c0_50], %173 {strides = array<i32>} : memref<1x8x128xf32, #tpu.memory_space<vmem>>, vector<1x8x128xf32>,
    %c0_51 = arith.constant 0 : index
    %c0_52 = arith.constant 0 : index
    %c0_53 = arith.constant 0 : index
    %174 = vector.load %arg9[%c0_51, %c0_52, %c0_53] : memref<1x8x128xf32, #tpu.memory_space<vmem>>, vector<1x8x128xf32>
    %175 = vector.shape_cast %174 : vector<1x8x128xf32> to vector<8x128xf32>
    %176 = vector.shape_cast %161 : vector<8x128xf32> to vector<1x8x128xf32>
    tpu.vector_store %arg9[%c0_51, %c0_52, %c0_53], %176 {strides = array<i32>} : memref<1x8x128xf32, #tpu.memory_space<vmem>>, vector<1x8x128xf32>,
    return
  }
  func.func @transform_0(%arg0: i32) -> (i32, i32, i32) {
    %c0_i32 = arith.constant 0 : i32
    %c0_i32_0 = arith.constant 0 : i32
    %c0_i32_1 = arith.constant 0 : i32
    return %arg0, %c0_i32, %c0_i32_0 : i32, i32, i32
  }
  func.func @transform_1(%arg0: i32) -> (i32, i32) {
    %c0_i32 = arith.constant 0 : i32
    %c0_i32_0 = arith.constant 0 : i32
    %c0_i32_1 = arith.constant 0 : i32
    return %c0_i32, %c0_i32_0 : i32, i32
  }
  func.func @transform_2(%arg0: i32) -> (i32, i32) {
    %c0_i32 = arith.constant 0 : i32
    %c0_i32_0 = arith.constant 0 : i32
    %c0_i32_1 = arith.constant 0 : i32
    return %c0_i32, %c0_i32_0 : i32, i32
  }
  func.func @transform_3(%arg0: i32) -> (i32, i32) {
    %c0_i32 = arith.constant 0 : i32
    %c0_i32_0 = arith.constant 0 : i32
    %c0_i32_1 = arith.constant 0 : i32
    return %c0_i32, %c0_i32_0 : i32, i32
  }
  func.func @transform_4(%arg0: i32) -> (i32, i32) {
    %c0_i32 = arith.constant 0 : i32
    %c0_i32_0 = arith.constant 0 : i32
    %c0_i32_1 = arith.constant 0 : i32
    return %c0_i32, %c0_i32_0 : i32, i32
  }
  func.func @transform_5(%arg0: i32) -> (i32, i32) {
    %c0_i32 = arith.constant 0 : i32
    %c0_i32_0 = arith.constant 0 : i32
    %c0_i32_1 = arith.constant 0 : i32
    return %c0_i32, %c0_i32_0 : i32, i32
  }
  func.func @transform_6(%arg0: i32) -> (i32, i32) {
    %c0_i32 = arith.constant 0 : i32
    %c0_i32_0 = arith.constant 0 : i32
    %c0_i32_1 = arith.constant 0 : i32
    return %c0_i32, %c0_i32_0 : i32, i32
  }
  func.func @transform_7(%arg0: i32) -> (i32, i32, i32) {
    %c0_i32 = arith.constant 0 : i32
    %c0_i32_0 = arith.constant 0 : i32
    %c0_i32_1 = arith.constant 0 : i32
    return %arg0, %c0_i32, %c0_i32_0 : i32, i32, i32
  }
  func.func @transform_8(%arg0: i32) -> (i32, i32, i32) {
    %c0_i32 = arith.constant 0 : i32
    %c0_i32_0 = arith.constant 0 : i32
    %c0_i32_1 = arith.constant 0 : i32
    return %arg0, %c0_i32, %c0_i32_0 : i32, i32, i32
  }
}

</mosaic_0001>

<bundles_post_ra>
// kernel: zoneout_lstm_sequence.1
= control target key start
LH: loop header
LB: loop body
LE: loop exit
PB: predicated region body
PF: predicated region fallthrough
CT: control target
= control target key end

     0   :  { %s1881_s0 = inlined_call_operand.hbm [shape: f32[16,8,64], index: 0, kind: input, shape index: {}]   ;;  %s1882_s1 = inlined_call_operand.hbm [shape: f32[128,512], index: 1, kind: input, shape index: {}]   ;;  %s1883_s2 = inlined_call_operand.hbm [shape: f32[64,512], index: 2, kind: input, shape index: {}]   ;;  %s1884_s3 = inlined_call_operand.hbm [shape: f32[8,128], index: 3, kind: input, shape index: {}]   ;;  %s1885_s4 = inlined_call_operand.hbm [shape: f32[8,128], index: 4, kind: input, shape index: {}]   ;;  %s1886_s5 = inlined_call_operand.vmem [shape: f32[5,128], index: 5, kind: input, shape index: {}]   ;;  %s1887_s6 = inlined_call_operand.hbm [shape: f32[5,128], index: 6, kind: input, shape index: {}]   ;;  %s1888_s7 = inlined_call_operand.hbm [shape: f32[16,8,128], index: 7, kind: output, shape index: {0}]   ;;  %s1889_s8 = inlined_call_operand.hbm [shape: f32[16,8,128], index: 8, kind: output, shape index: {1}]  }
   0x1   :  { %1894 = sst [smem:[#allocation24_spill]] %s1882_s1 }
   0x2   :  { %1895 = sst [smem:[#allocation25_spill]] %s1883_s2 }
   0x3   :  { %1896 = sst [smem:[#allocation26_spill]] %s1884_s3 }
   0x4   :  { %14 = vsyncpa [#allocation5], 0 }
   0x5   :  { %16 = vsyncpa [#allocation5 + $0x1], 0 }
   0x6   :  { %17 = vsyncpa [#allocation8], 0 }
   0x7   :  { %18 = vsyncpa [#allocation11], 0 }
   0x8   :  { %19 = vsyncpa [#allocation14], 0 }
   0x9   :  { %20 = vsyncpa [#allocation6], 0 }
   0xa   :  { %22 = vsyncpa [#allocation6 + $0x1], 0 }
   0xb   :  { %23 = vsyncpa [#allocation17], 0 }
   0xc   :  { %25 = vsyncpa [#allocation17 + $0x1], 0  ;;  %s1596_s27 = smov 0   ;;  %s1598_s28 = smov 0  }
   0xd   :  { %s1600_s29 = smov 0   ;;  %s1602_s30 = smov 0  }
   0xe LB: > { %s1540_s9 = smov [#allocation7]   ;;  %s1617_s11 = sadd.s32 4294967295, %s1538_s30   ;;  %s1538_s30 = sphi %s1602_s30, %s1922_s30   ;;  %s1534_s29 = sphi %s1600_s29, %s1921_s29   ;;  %s1530_s28 = sphi %s1598_s28, %s1920_s28   ;;  %s1526_s27 = sphi %s1596_s27, %s1919_s27  }
   0xf   : > { %s252_s10 = sshll.u32 %s1540_s9, 4  ;;  %p1113_p0 = scmp.ge.s32.totalorder %s1538_s30, 1  ;;  %s253_s10 = int_to_ptr.vmem [resolvable:$true] %s252_s10 }
  0x10   : > { %p1890_p1 = scmp.eq.s32.totalorder %s1617_s11, 0  ;;  %p240_p2 = scmp.lt.s32.totalorder %s1538_s30, 17 }
  0x11   : > { %s1541_s13 = smov [#allocation10]   ;;  %s1542_s16 = smov [#allocation9]  }
  0x12   : > { %p1623_p4 = pnand %p1113_p0, %p240_p2  ;;  %s279_s14 = sshll.u32 %s1541_s13, 4  ;;  %s280_s14 = int_to_ptr.vmem [resolvable:$true] %s279_s14 }
  0x13   : > { %s265_s17 = sshll.u32 %s1542_s16, 4  ;;  %s1285_s19 = scalar_lea.vmem %s253_s10, 8192  ;;  %s1635_s17 = int_to_ptr.vmem [resolvable:$true] %s265_s17 }
  0x14   : > { %s1897_s12 = scalar_select %p1623_p4, 1, 0 }
  0x15   : > { %p1169_p5 = pneg %p1623_p4  ;;  %p1286_p8 = scmp.ne.s32.totalorder %s253_s10, %s1285_s19 }
  0x16   : > { %p1293_p11 = scmp.lt.s32.totalorder %s253_s10, %s253_s10  ;;  %p1294_p12 = scmp.lt.s32.totalorder %s1285_s19, %s1285_s19 }
  0x17   : > { %p1631_p6 = pnand %p1169_p5, %p1890_p1 }
  0x18   : > { %p1295_p13 = por %p1294_p12, %p1293_p11 }
  0x19   : > { %p1639_p7 = pneg %p1631_p6 }
  0x1b   : > { %p1288_p9 = pnand %p1286_p8, %p1639_p7 }
  0x1d   : > { %p1289_p10 = pneg %p1288_p9 }
  0x1f   : > { %p1296_p0 = pnand %p1295_p13, %p1289_p10 }
  0x21   : > { %1299 = shalt.err (!%p1296_p0)
}
  0x22   : > { %s1543_s20 = smov 512   ;;  %s1544_s21 = smov 32  }
  0x23   : > { %s1900_s1 = sld [smem:[#allocation24_spill]]  ;;  %s1311_s24 = scalar_lea.vmem %s280_s14, 128 }
  0x24   : > { %p1312_p2 = scmp.ne.s32.totalorder %s280_s14, %s1311_s24  ;;  %p1319_p9 = scmp.lt.s32.totalorder %s280_s14, %s280_s14 }
  0x25   : > { %p1320_p3 = scmp.lt.s32.totalorder %s1311_s24, %s1311_s24 }
  0x26   : > { %p1314_p5 = pnand %p1312_p2, %p1639_p7 }
  0x27   : > { %p1321_p1 = por %p1320_p3, %p1319_p9 }
  0x28   : > { %p1315_p8 = pneg %p1314_p5 }
  0x29   : > { %1172 = dma.hbm_to_vmem [thread:$0]  (!%p1631_p6), %s1900_s1, 8192, %s253_s10, [#allocation8], %s1543_s20, %s1543_s20, %s1544_s21  }
  0x2a   : > { %p1322_p11 = pnand %p1321_p1, %p1315_p8 }
  0x2c   : > { %1325 = shalt.err (!%p1322_p11)
}
  0x2d   : > { %s1901_s3 = sld [smem:[#allocation26_spill]]  ;;  %s1337_s9 = scalar_lea.vmem %s1635_s17, 4096 }
  0x2e   : > { %p1338_p10 = scmp.ne.s32.totalorder %s1635_s17, %s1337_s9  ;;  %p1345_p0 = scmp.lt.s32.totalorder %s1635_s17, %s1635_s17 }
  0x2f   : > { %p1346_p3 = scmp.lt.s32.totalorder %s1337_s9, %s1337_s9 }
  0x30   : > { %p1340_p12 = pnand %p1338_p10, %p1639_p7 }
  0x31   : > { %p1347_p1 = por %p1346_p3, %p1345_p0 }
  0x32   : > { %p1341_p13 = pneg %p1340_p12 }
  0x33   : > { %1178 = dma.hbm_to_vmem [thread:$0]  (!%p1631_p6), %s1901_s3, 128, %s280_s14, [#allocation11]  }
  0x34   : > { %p1348_p2 = pnand %p1347_p1, %p1341_p13 }
  0x36   : > { %1351 = shalt.err (!%p1348_p2)
}
  0x37   : > { %s1902_s2 = sld [smem:[#allocation25_spill]]  ;;  %s1545_s14 = smov [#allocation12]  }
  0x38   : > { %s290_s16 = sshll.u32 %s1545_s14, 4  ;;  %s1546_s19 = smov [#allocation13]   ;;  %s291_s16 = int_to_ptr.vmem [resolvable:$true] %s290_s16 }
  0x39   : > { %s304_s22 = sshll.u32 %s1546_s19, 4  ;;  %s1363_s23 = scalar_lea.vmem %s291_s16, 128  ;;  %s305_s22 = int_to_ptr.vmem [resolvable:$true] %s304_s22 }
  0x3a   : > { %p1364_p5 = scmp.ne.s32.totalorder %s291_s16, %s1363_s23  ;;  %p1371_p11 = scmp.lt.s32.totalorder %s291_s16, %s291_s16 }
  0x3b   : > { %p1372_p10 = scmp.lt.s32.totalorder %s1363_s23, %s1363_s23 }
  0x3c   : > { %p1366_p8 = pnand %p1364_p5, %p1639_p7 }
  0x3d   : > { %1175 = dma.hbm_to_vmem [thread:$0]  (!%p1631_p6), %s1902_s2, 4096, %s1635_s17, [#allocation8], %s1543_s20, %s1543_s20, %s1544_s21  }
  0x3e   : > { %p1367_p9 = pneg %p1366_p8  ;;  %p1373_p12 = por %p1372_p10, %p1371_p11 }
  0x40   : > { %p1374_p13 = pnand %p1373_p12, %p1367_p9 }
  0x42   : > { %1377 = shalt.err (!%p1374_p13)
}
  0x43   : > { %1181 = dma.hbm_to_vmem [thread:$0]  (!%p1631_p6), %s1885_s4, 128, %s291_s16, [#allocation11]  }
  0x44   : > { %s1389_s17 = scalar_lea.vmem %s305_s22, 128  ;;  %p1397_p2 = scmp.lt.s32.totalorder %s305_s22, %s305_s22 }
  0x45   : > { %p1390_p0 = scmp.ne.s32.totalorder %s305_s22, %s1389_s17  ;;  %p1398_p5 = scmp.lt.s32.totalorder %s1389_s17, %s1389_s17 }
  0x47   : > { %p1392_p3 = pnand %p1390_p0, %p1639_p7  ;;  %p1399_p8 = por %p1398_p5, %p1397_p2 }
  0x49   : > { %p1393_p1 = pneg %p1392_p3 }
  0x4b   : > { %p1400_p4 = pnand %p1399_p8, %p1393_p1 }
  0x4d   : > { %1403 = shalt.err (!%p1400_p4)
}
  0x4e   : > { %1184 = dma.hbm_to_vmem [thread:$0]  (!%p1631_p6), %s1887_s6, 128, %s305_s22, [#allocation14]  }
  0x4f   : > { %s1112_s18 = sadd.s32 4294967294, %s1538_s30   ;;  %s1685_s15 = sadd.s32 1, %s1538_s30  }
  0x50   : > { %s38_s26 = sadd.s32 1, %s1534_s29  ;;  %s35_s9 = ssub.s32 %s1538_s30, %s1685_s15 }
  0x51   : > { %p45_p4 = scmp.ne.s32.totalorder %s1534_s29, %s1530_s28  ;;  %p36_p7 = scmp.eq.s32.totalorder %s35_s9, 0 }
  0x52   : > { %p46_p9 = scmp.eq.s32.totalorder %s1538_s30, 0  ;;  %p51_p11 = scmp.ne.s32.totalorder %s1530_s28, %s1526_s27 }
  0x53   : > { %p201_p10 = scmp.eq.s32.totalorder %s1617_s11, 15  ;;  %p1903_p13 = scmp.eq.s32.totalorder %s1617_s11, 0 }
  0x54   : > { %s1697_s10 = scalar_select %p36_p7, %s1534_s29, %s38_s26  }
  0x55   : > { %p47_p12 = por %p46_p9, %p45_p4  ;;  %p1701_p0 = por %p1903_p13, %p51_p11 }
  0x56   : > { %p1705_p6 = por %p201_p10, %p45_p4  ;;  %p207_p3 = scmp.eq.s32.totalorder %s1112_s18, 15 }
  0x57   : > { %s1904_s13 = scalar_select %p1701_p0, 1, 0 }
  0x58   : > { %s1905_s14 = scalar_select %p1705_p6, 1, 0 }
  0x59   : > { %p1201_p1 = scmp.lt.s32.totalorder %s1538_s30, 16  ;;  %s315_s16 = sand.u32 1, %s1534_s29  }
  0x5a   : > { %p1711_p2 = por %p207_p3, %p51_p11  ;;  %s1120_s22 = sshll.u32 %s315_s16, 3 }
  0x5b   : > { %s1121_s23 = sshll.u32 %s1538_s30, 7  ;;  %s319_s20 = scalar_lea.vmem [#allocation4], %s1120_s22 }
  0x5c   : > { %s1906_s19 = scalar_select %p1711_p2, 1, 0 }
  0x5d   : > { %s1719_s17 = scalar_lea.hbm %s1881_s0, %s1121_s23  ;;  %s326_s21 = sshll.u32 %s319_s20, 4  ;;  %s327_s21 = int_to_ptr.vmem [resolvable:$true] %s326_s21 }
  0x5e   : > { %p1721_p5 = pnand %p1201_p1, %p47_p12  ;;  %s316_s26 = scalar_lea.sflag [#allocation5], %s315_s16 }
  0x5f   : > { %s1404_s9 = scalar_lea.hbm %s1719_s17, 128  ;;  %s1409_s25 = scalar_lea.hbm %s1881_s0, 2048 }
  0x60   : > { %p1405_p8 = scmp.ne.s32.totalorder %s1719_s17, %s1404_s9  ;;  %p1406_p4 = pneg %p1721_p5 }
  0x61   : > { %p1410_p11 = scmp.lt.s32.totalorder %s1719_s17, %s1881_s0  ;;  %p1411_p10 = scmp.lt.s32.totalorder %s1409_s25, %s1404_s9 }
  0x62   : > { %p1407_p7 = pnand %p1406_p4, %p1405_p8 }
  0x63   : > { %p1412_p12 = por %p1411_p10, %p1410_p11 }
  0x64   : > { %p1408_p9 = pneg %p1407_p7 }
  0x66   : > { %p1413_p13 = pnand %p1412_p12, %p1408_p9 }
  0x68   : > { %1416 = shalt.err (!%p1413_p13)
}
  0x69   : > { %s1417_s20 = scalar_lea.vmem %s327_s21, 128  ;;  %s1547_s16 = smov [#allocation4]  }
  0x6a   : > { %p1418_p3 = scmp.ne.s32.totalorder %s327_s21, %s1417_s20  ;;  %s1422_s2 = sshll.u32 %s1547_s16, 4  ;;  %s1423_s2 = int_to_ptr.vmem [resolvable:$false] %s1422_s2 }
  0x6b   : > { %s1424_s3 = scalar_lea.vmem %s1423_s2, 256  ;;  %p1425_p8 = scmp.lt.s32.totalorder %s327_s21, %s1423_s2 }
  0x6c   : > { %p1420_p1 = pnand %p1418_p3, %p1406_p4  ;;  %p1426_p7 = scmp.lt.s32.totalorder %s1424_s3, %s1417_s20 }
  0x6e   : > { %p1421_p2 = pneg %p1420_p1  ;;  %p1427_p6 = por %p1426_p7, %p1425_p8 }
  0x70   : > { %p1428_p0 = pnand %p1427_p6, %p1421_p2 }
  0x72   : > { %1431 = shalt.err (!%p1428_p0)
}
  0x73   : > { %1188 = dma.hbm_to_vmem [thread:$0]  (!%p1721_p5), %s1719_s17, 128, %s327_s21, %s316_s26  }
  0x74   : > { %p1908_p9 = scmp.ne.s32.totalorder %s1897_s12, 0 }
  0x75   : > { %s1742_s1 = sand.u32 (!%p1908_p9), 1, %s1530_s28   ;;  %p1909_p6 = scmp.ne.s32.totalorder (!%p1908_p9), %s1904_s13, 0 }
  0x76   : > { %335 = sbr.rel (%p1908_p9) target bundleno = 1078 (0x436), region = 48  ;;  %s1745_s9 = sshll.u32 (!%p1908_p9), %s1742_s1, 3 }
  0x77   : > { %s338_s2 = scalar_lea.sflag (!%p1908_p9), [#allocation5], %s1742_s1  ;;  %s341_s3 = scalar_lea.vmem (!%p1908_p9), [#allocation4], %s1745_s9 }
  0x7b   : > { %1501 = dma.done.wait (%p1909_p6), %s338_s2, 128  }
  0x7c   : > { %1503 = vsyncadd (%p1909_p6), %s338_s2, 4294967168  ;;  %p1910_p0 = scmp.eq.s32.totalorder %s1617_s11, 0 }
  0x7e   : > { %1505 = dma.done.wait (%p1910_p0), [#allocation8], 12288   ;;  %p1911_p2 = pmov %p1910_p0 }
  0x7f   : > { %p1912_p5 = pmov %p1910_p0 }
  0x80   : > { %1507 = vsyncadd (%p1911_p2), [#allocation8], 4294955008 }
  0x81   : > { %1509 = dma.done.wait (%p1912_p5), [#allocation11], 256   ;;  %p1913_p4 = pmov %p1910_p0 }
  0x82   : > { %p1914_p11 = pmov %p1910_p0 }
  0x83   : > { %1511 = vsyncadd (%p1913_p4), [#allocation11], 4294967040 }
  0x84   : > { %1513 = dma.done.wait (%p1914_p11), [#allocation14], 128   ;;  %p1915_p10 = pmov %p1910_p0 }
  0x85   : > { %s391_s12 = scalar_lea.vmem [#allocation15], %s1745_s9  ;;  %s398_s13 = scalar_lea.vmem [#allocation16], %s1745_s9 }
  0x86   : > { %1515 = vsyncadd (%p1915_p10), [#allocation14], 4294967168  ;;  %p1916_p12 = scmp.ne.s32.totalorder %s1617_s11, 0 }
  0x88   : > { %402 = sbr.rel (%p1916_p12) target bundleno = 143 (0x8f), region = 76 }
  0x8d   : > { %v403_v0 = vld [vmem:[#allocation10] sm:$0xff]  ;;  %v405_v1 = vld [vmem:[#allocation12] sm:$0xff] }
  0x8e   : > { %404 = vst [vmem:[#allocation2] sm:$0xff] %v403_v0  ;;  %406 = vst [vmem:[#allocation3] sm:$0xff] %v405_v1 }
  0x8f PF: > { %v503_v2 = vld [vmem:[#allocation9 + $0xe8] sm:$0xff]  ;;  %v505_v3 = vld [vmem:[#allocation9 + $0xf8] sm:$0xff]  ;;  %v502_v4 = vld [vmem:[#allocation9 + $0xe0] sm:$0xff]  ;;  %vm506_vm0 = vcmask 523264   ;;  %v1548_v36 = vmov 0.0   ;;  %s1139_s18 = sshll.u32 %s1617_s11, 7 }
  0x90   : > { %526 = vmatprep.subr.mxu0 %v503_v2  ;;  %597 = vmatprep.subr.mxu1 %v505_v3  ;;  %v504_v5 = vld [vmem:[#allocation9 + $0xf0] sm:$0xff]  ;;  %v499_v6 = vld [vmem:[#allocation9 + $0xc8] sm:$0xff]  ;;  %v501_v7 = vld [vmem:[#allocation9 + $0xd8] sm:$0xff]  ;;  %s962_s26 = sshll.u32 %s398_s13, 4  ;;  %s1809_s25 = scalar_lea.hbm %s1889_s8, %s1139_s18  ;;  %s1811_s26 = int_to_ptr.vmem [resolvable:$true] %s962_s26 }
  0x91   : > { %527 = vmatpush1.msra.mxu0 %v502_v4  ;;  %598 = vmatpush1.msra.mxu1 %v504_v5  ;;  %v498_v8 = vld [vmem:[#allocation9 + $0xc0] sm:$0xff]  ;;  %v500_v9 = vld [vmem:[#allocation9 + $0xd0] sm:$0xff]  ;;  %v495_v10 = vld [vmem:[#allocation9 + $0xa8] sm:$0xff]  ;;  %s936_s22 = scalar_lea.sflag [#allocation17], %s1742_s1  ;;  %s1432_s20 = scalar_lea.vmem %s1811_s26, 128 }
  0x92   : > { %528 = vmatprep.subr.mxu0 %v499_v6  ;;  %599 = vmatprep.subr.mxu1 %v501_v7  ;;  %v497_v11 = vld [vmem:[#allocation9 + $0xb8] sm:$0xff]  ;;  %v494_v12 = vld [vmem:[#allocation9 + $0xa0] sm:$0xff]  ;;  %v496_v13 = vld [vmem:[#allocation9 + $0xb0] sm:$0xff]  ;;  %p1433_p13 = scmp.ne.s32.totalorder %s1811_s26, %s1432_s20  ;;  %p1917_p3 = scmp.ne.s32.totalorder %s1905_s14, 0 }
  0x93   : > { %529 = vmatpush1.msra.mxu0 %v498_v8  ;;  %600 = vmatpush1.msra.mxu1 %v500_v9  ;;  %v491_v14 = vld [vmem:[#allocation9 + $0x88] sm:$0xff]  ;;  %v493_v15 = vld [vmem:[#allocation9 + $0x98] sm:$0xff]  ;;  %v490_v16 = vld [vmem:[#allocation9 + $0x80] sm:$0xff]  ;;  %s1549_s16 = smov [#allocation16]  }
  0x94   : > { %530 = vmatprep.subr.mxu0 %v495_v10  ;;  %601 = vmatprep.subr.mxu1 %v497_v11  ;;  %v492_v17 = vld [vmem:[#allocation9 + $0x90] sm:$0xff]  ;;  %v487_v18 = vld [vmem:[#allocation9 + $0x68] sm:$0xff]  ;;  %v489_v19 = vld [vmem:[#allocation9 + $0x78] sm:$0xff]  ;;  %p1434_p1 = pnand %p1433_p13, %p1917_p3  ;;  %s1436_s2 = sshll.u32 %s1549_s16, 4  ;;  %s1437_s2 = int_to_ptr.vmem [resolvable:$false] %s1436_s2 }
  0x95   : > { %531 = vmatpush1.msra.mxu0 %v494_v12  ;;  %602 = vmatpush1.msra.mxu1 %v496_v13  ;;  %v486_v20 = vld [vmem:[#allocation9 + $0x60] sm:$0xff]  ;;  %v488_v21 = vld [vmem:[#allocation9 + $0x70] sm:$0xff]  ;;  %v483_v22 = vld [vmem:[#allocation9 + $0x48] sm:$0xff]  ;;  %p1439_p7 = scmp.lt.s32.totalorder %s1811_s26, %s1437_s2 }
  0x96   : > { %532 = vmatprep.subr.mxu0 %v491_v14  ;;  %603 = vmatprep.subr.mxu1 %v493_v15  ;;  %v485_v23 = vld [vmem:[#allocation9 + $0x58] sm:$0xff]  ;;  %v482_v24 = vld [vmem:[#allocation9 + $0x40] sm:$0xff]  ;;  %v484_v25 = vld [vmem:[#allocation9 + $0x50] sm:$0xff]  ;;  %p1435_p8 = pneg %p1434_p1 }
  0x97   : > { %533 = vmatpush1.msra.mxu0 %v490_v16  ;;  %604 = vmatpush1.msra.mxu1 %v492_v17  ;;  %v479_v26 = vld [vmem:[#allocation9 + $0x28] sm:$0xff]  ;;  %v481_v27 = vld [vmem:[#allocation9 + $0x38] sm:$0xff]  ;;  %v478_v28 = vld [vmem:[#allocation9 + $0x20] sm:$0xff] }
  0x98   : > { %534 = vmatprep.subr.mxu0 %v487_v18  ;;  %605 = vmatprep.subr.mxu1 %v489_v19  ;;  %v480_v29 = vld [vmem:[#allocation9 + $0x30] sm:$0xff]  ;;  %v475_v30 = vld [vmem:[#allocation9 + $0x8] sm:$0xff]  ;;  %v477_v31 = vld [vmem:[#allocation9 + $0x18] sm:$0xff] }
  0x99   : > { %535 = vmatpush1.msra.mxu0 %v486_v20  ;;  %606 = vmatpush1.msra.mxu1 %v488_v21  ;;  %v474_v32 = vld [vmem:[#allocation9] sm:$0xff]  ;;  %v476_v33 = vld [vmem:[#allocation9 + $0x10] sm:$0xff]  ;;  %v470_v35 = vld [vmem:[#allocation7 + $0x1e8] sm:$0xff] }
  0x9a   : > { %536 = vmatprep.subr.mxu0 %v483_v22  ;;  %607 = vmatprep.subr.mxu1 %v485_v23  ;;  %v473_v34 = vld [vmem:[%s341_s3] sm:$0xff]  ;;  %v469_v38 = vld [vmem:[#allocation7 + $0x1e0] sm:$0xff]  ;;  %v466_v40 = vld [vmem:[#allocation7 + $0x1c8] sm:$0xff]  ;;  %s1438_s3 = scalar_lea.vmem %s1437_s2, 256 }
  0x9b   : > { %537 = vmatpush1.msra.mxu0 %v482_v24  ;;  %608 = vmatpush1.msra.mxu1 %v484_v25  ;;  %v472_v37 = vld [vmem:[#allocation7 + $0x1f8] sm:$0xff]  ;;  %v471_v39 = vld [vmem:[#allocation7 + $0x1f0] sm:$0xff]  ;;  %v465_v42 = vld [vmem:[#allocation7 + $0x1c0] sm:$0xff]  ;;  %p1440_p9 = scmp.lt.s32.totalorder %s1438_s3, %s1432_s20 }
  0x9c   : > { %538 = vmatprep.subr.mxu0 %v479_v26  ;;  %609 = vmatprep.subr.mxu1 %v481_v27  ;;  %v468_v41 = vld [vmem:[#allocation7 + $0x1d8] sm:$0xff]  ;;  %v467_v43 = vld [vmem:[#allocation7 + $0x1d0] sm:$0xff]  ;;  %v462_v44 = vld [vmem:[#allocation7 + $0x1a8] sm:$0xff] }
  0x9d   : > { %539 = vmatpush1.msra.mxu0 %v478_v28  ;;  %610 = vmatpush1.msra.mxu1 %v480_v29  ;;  %v464_v45 = vld [vmem:[#allocation7 + $0x1b8] sm:$0xff]  ;;  %v461_v46 = vld [vmem:[#allocation7 + $0x1a0] sm:$0xff]  ;;  %v463_v47 = vld [vmem:[#allocation7 + $0x1b0] sm:$0xff]  ;;  %p1441_p6 = por %p1440_p9, %p1439_p7 }
  0x9e   : > { %540 = vmatprep.subr.mxu0 %v475_v30  ;;  %611 = vmatprep.subr.mxu1 %v477_v31  ;;  %v458_v48 = vld [vmem:[#allocation7 + $0x188] sm:$0xff]  ;;  %v460_v49 = vld [vmem:[#allocation7 + $0x198] sm:$0xff]  ;;  %v457_v50 = vld [vmem:[#allocation7 + $0x180] sm:$0xff] }
  0x9f   : > { %541 = vmatpush1.msra.mxu0 %v474_v32  ;;  %574 = vmatprep.mubr.f32.mxu0 %v1548_v36  ;;  %v459_v51 = vld [vmem:[#allocation7 + $0x190] sm:$0xff]  ;;  %v454_v52 = vld [vmem:[#allocation7 + $0x168] sm:$0xff]  ;;  %v456_v53 = vld [vmem:[#allocation7 + $0x178] sm:$0xff]  ;;  %p1442_p0 = pnand %p1441_p6, %p1435_p8 }
  0xa0   : > { %612 = vmatpush1.msra.mxu1 %v476_v33  ;;  %1132 = vmatmul.mubr.msk.f32.vlgmr.msra.gmra.mxu0 %vm506_vm0, %v473_v34  ;;  %v453_v54 = vld [vmem:[#allocation7 + $0x160] sm:$0xff]  ;;  %v455_v55 = vld [vmem:[#allocation7 + $0x170] sm:$0xff]  ;;  %v450_v56 = vld [vmem:[#allocation7 + $0x148] sm:$0xff] }
  0xa1   : > { %645 = vmatprep.mubr.f32.mxu1 %v1548_v36  ;;  %652 = vmatprep.subr.mxu0 %v470_v35  ;;  %v452_v57 = vld [vmem:[#allocation7 + $0x158] sm:$0xff]  ;;  %v449_v58 = vld [vmem:[#allocation7 + $0x140] sm:$0xff]  ;;  %v451_v59 = vld [vmem:[#allocation7 + $0x150] sm:$0xff] }
  0xa2   : > { %723 = vmatprep.subr.mxu1 %v472_v37  ;;  %1133 = vmatmul.mubr.msk.f32.vlgmr.msra.gmra.mxu1 %vm506_vm0, %v473_v34  ;;  %v446_v60 = vld [vmem:[#allocation7 + $0x128] sm:$0xff]  ;;  %v448_v61 = vld [vmem:[#allocation7 + $0x138] sm:$0xff]  ;;  %v445_v62 = vld [vmem:[#allocation7 + $0x120] sm:$0xff] }
  0xa3   : > { %653 = vmatpush1.msra.mxu0 %v469_v38  ;;  %724 = vmatpush1.msra.mxu1 %v471_v39  ;;  %v447_v63 = vld [vmem:[#allocation7 + $0x130] sm:$0xff]  ;;  %v442_v0 = vld [vmem:[#allocation7 + $0x108] sm:$0xff]  ;;  %v444_v1 = vld [vmem:[#allocation7 + $0x118] sm:$0xff] }
  0xa4   : > { %654 = vmatprep.subr.mxu0 %v466_v40  ;;  %725 = vmatprep.subr.mxu1 %v468_v41  ;;  %v441_v2 = vld [vmem:[#allocation7 + $0x100] sm:$0xff]  ;;  %v443_v3 = vld [vmem:[#allocation7 + $0x110] sm:$0xff]  ;;  %v438_v4 = vld [vmem:[#allocation7 + $0xe8] sm:$0xff] }
  0xa5   : > { %655 = vmatpush1.msra.mxu0 %v465_v42  ;;  %726 = vmatpush1.msra.mxu1 %v467_v43  ;;  %v440_v5 = vld [vmem:[#allocation7 + $0xf8] sm:$0xff]  ;;  %v437_v6 = vld [vmem:[#allocation7 + $0xe0] sm:$0xff]  ;;  %v439_v7 = vld [vmem:[#allocation7 + $0xf0] sm:$0xff] }
  0xa6   : > { %656 = vmatprep.subr.mxu0 %v462_v44  ;;  %727 = vmatprep.subr.mxu1 %v464_v45  ;;  %v434_v8 = vld [vmem:[#allocation7 + $0xc8] sm:$0xff]  ;;  %v436_v9 = vld [vmem:[#allocation7 + $0xd8] sm:$0xff]  ;;  %v433_v10 = vld [vmem:[#allocation7 + $0xc0] sm:$0xff] }
  0xa7   : > { %657 = vmatpush1.msra.mxu0 %v461_v46  ;;  %728 = vmatpush1.msra.mxu1 %v463_v47  ;;  %v435_v11 = vld [vmem:[#allocation7 + $0xd0] sm:$0xff]  ;;  %v430_v12 = vld [vmem:[#allocation7 + $0xa8] sm:$0xff]  ;;  %v432_v13 = vld [vmem:[#allocation7 + $0xb8] sm:$0xff] }
  0xa8   : > { %658 = vmatprep.subr.mxu0 %v458_v48  ;;  %729 = vmatprep.subr.mxu1 %v460_v49  ;;  %v429_v14 = vld [vmem:[#allocation7 + $0xa0] sm:$0xff]  ;;  %v431_v15 = vld [vmem:[#allocation7 + $0xb0] sm:$0xff]  ;;  %v426_v16 = vld [vmem:[#allocation7 + $0x88] sm:$0xff] }
  0xa9   : > { %659 = vmatpush1.msra.mxu0 %v457_v50  ;;  %730 = vmatpush1.msra.mxu1 %v459_v51  ;;  %v428_v17 = vld [vmem:[#allocation7 + $0x98] sm:$0xff]  ;;  %v425_v18 = vld [vmem:[#allocation7 + $0x80] sm:$0xff]  ;;  %v427_v19 = vld [vmem:[#allocation7 + $0x90] sm:$0xff] }
  0xaa   : > { %660 = vmatprep.subr.mxu0 %v454_v52  ;;  %731 = vmatprep.subr.mxu1 %v456_v53  ;;  %v422_v20 = vld [vmem:[#allocation7 + $0x68] sm:$0xff]  ;;  %v424_v21 = vld [vmem:[#allocation7 + $0x78] sm:$0xff]  ;;  %v421_v22 = vld [vmem:[#allocation7 + $0x60] sm:$0xff] }
  0xab   : > { %661 = vmatpush1.msra.mxu0 %v453_v54  ;;  %732 = vmatpush1.msra.mxu1 %v455_v55  ;;  %v423_v23 = vld [vmem:[#allocation7 + $0x70] sm:$0xff]  ;;  %v418_v24 = vld [vmem:[#allocation7 + $0x48] sm:$0xff]  ;;  %v420_v25 = vld [vmem:[#allocation7 + $0x58] sm:$0xff] }
  0xac   : > { %662 = vmatprep.subr.mxu0 %v450_v56  ;;  %733 = vmatprep.subr.mxu1 %v452_v57  ;;  %v417_v26 = vld [vmem:[#allocation7 + $0x40] sm:$0xff]  ;;  %v419_v27 = vld [vmem:[#allocation7 + $0x50] sm:$0xff]  ;;  %v414_v28 = vld [vmem:[#allocation7 + $0x28] sm:$0xff] }
  0xad   : > { %663 = vmatpush1.msra.mxu0 %v449_v58  ;;  %734 = vmatpush1.msra.mxu1 %v451_v59  ;;  %v416_v29 = vld [vmem:[#allocation7 + $0x38] sm:$0xff]  ;;  %v413_v30 = vld [vmem:[#allocation7 + $0x20] sm:$0xff]  ;;  %v415_v31 = vld [vmem:[#allocation7 + $0x30] sm:$0xff] }
  0xae   : > { %664 = vmatprep.subr.mxu0 %v446_v60  ;;  %735 = vmatprep.subr.mxu1 %v448_v61  ;;  %v410_v32 = vld [vmem:[#allocation7 + $0x8] sm:$0xff]  ;;  %v412_v33 = vld [vmem:[#allocation7 + $0x18] sm:$0xff]  ;;  %v409_v34 = vld [vmem:[#allocation7] sm:$0xff] }
  0xaf   : > { %665 = vmatpush1.msra.mxu0 %v445_v62  ;;  %736 = vmatpush1.msra.mxu1 %v447_v63  ;;  %v411_v35 = vld [vmem:[#allocation7 + $0x10] sm:$0xff]  ;;  %v407_v37 = vld [vmem:[#allocation2] sm:$0xff] }
  0xb0   : > { %666 = vmatprep.subr.mxu0 %v442_v0  ;;  %737 = vmatprep.subr.mxu1 %v444_v1  ;;  %v808_v1 = vlaneseq }
  0xb1   : > { %667 = vmatpush1.msra.mxu0 %v441_v2  ;;  %738 = vmatpush1.msra.mxu1 %v443_v3 }
  0xb2   : > { %668 = vmatprep.subr.mxu0 %v438_v4  ;;  %739 = vmatprep.subr.mxu1 %v440_v5 }
  0xb3   : > { %669 = vmatpush1.msra.mxu0 %v437_v6  ;;  %740 = vmatpush1.msra.mxu1 %v439_v7  ;;  %v1777_v6 = vshrl.u32 %v808_v1, 7 }
  0xb4   : > { %670 = vmatprep.subr.mxu0 %v434_v8  ;;  %741 = vmatprep.subr.mxu1 %v436_v9 }
  0xb5   : > { %671 = vmatpush1.msra.mxu0 %v433_v10  ;;  %742 = vmatpush1.msra.mxu1 %v435_v11  ;;  %v810_v10 = vsub.s32 0, %v1777_v6 }
  0xb6   : > { %672 = vmatprep.subr.mxu0 %v430_v12  ;;  %743 = vmatprep.subr.mxu1 %v432_v13  ;;  %v1783_v12 = vld [vmem:[%s1886_s5] sm:$0x1f] }
  0xb7   : > { %673 = vmatpush1.msra.mxu0 %v429_v14  ;;  %744 = vmatpush1.msra.mxu1 %v431_v15  ;;  %v1785_v14 = vld [vmem:[#allocation13] sm:$0x1f]  ;;  %v811_v15 = vrot.slane %v1783_v12, %v810_v10 }
  0xb8   : > { %674 = vmatprep.subr.mxu0 %v426_v16  ;;  %745 = vmatprep.subr.mxu1 %v428_v17  ;;  %v831_v17 = vsub.s32 1, %v1777_v6 }
  0xb9   : > { %675 = vmatpush1.msra.mxu0 %v425_v18  ;;  %746 = vmatpush1.msra.mxu1 %v427_v19  ;;  %v816_v18 = vrot.slane %v1785_v14, %v810_v10 }
  0xba   : > { %676 = vmatprep.subr.mxu0 %v422_v20  ;;  %747 = vmatprep.subr.mxu1 %v424_v21  ;;  %v832_v21 = vrot.slane %v1783_v12, %v831_v17 }
  0xbb   : > { %677 = vmatpush1.msra.mxu0 %v421_v22  ;;  %748 = vmatpush1.msra.mxu1 %v423_v23 }
  0xbc   : > { %678 = vmatprep.subr.mxu0 %v418_v24  ;;  %749 = vmatprep.subr.mxu1 %v420_v25  ;;  %v837_v24 = vrot.slane %v1785_v14, %v831_v17 }
  0xbd   : > { %679 = vmatpush1.msra.mxu0 %v417_v26  ;;  %750 = vmatpush1.msra.mxu1 %v419_v27 }
  0xbe   : > { %680 = vmatprep.subr.mxu0 %v414_v28  ;;  %751 = vmatprep.subr.mxu1 %v416_v29 }
  0xbf   : > { %681 = vmatpush1.msra.mxu0 %v413_v30  ;;  %752 = vmatpush1.msra.mxu1 %v415_v31  ;;  %v873_v30 = vsub.s32 3, %v1777_v6 }
  0xc0   : > { %682 = vmatprep.subr.mxu0 %v410_v32  ;;  %753 = vmatprep.subr.mxu1 %v412_v33 }
  0xc1   : > { %683 = vmatpush1.msra.mxu0 %v409_v34  ;;  %716 = vmatprep.mubr.f32.mxu0 %v1548_v36  ;;  %v874_v32 = vrot.slane %v1783_v12, %v873_v30 }
  0xc2   : > { %754 = vmatpush1.msra.mxu1 %v411_v35  ;;  %787 = vmatprep.mubr.f32.mxu1 %v1548_v36  ;;  %v879_v35 = vrot.slane %v1785_v14, %v873_v30 }
  0xc3   : > { %717 = vmatmul.mubr.f32.vlgmr.msra.gmra.mxu0 %v407_v37  ;;  %788 = vmatmul.mubr.f32.vlgmr.msra.gmra.mxu1 %v407_v37 }
 0x160   : > { %v576_v38 = vpop.f32.mrf.mxu0 }
 0x162   : > { %v647_v39 = vpop.f32.mrf.mxu1  ;;  %v578_v40 = vpop.f32.mrf.mxu0 }
 0x164   : > { %v649_v41 = vpop.f32.mrf.mxu1 }
 0x183   : > { %v718_v42 = vpop.f32.mrf.mxu0  ;;  %v789_v43 = vpop.f32.mrf.mxu1 }
 0x184   : > { %v719_v44 = vadd.f32 %v718_v42, %v576_v38  ;;  %v790_v45 = vadd.f32 %v789_v43, %v647_v39  ;;  %v408_v43 = vld [vmem:[#allocation3] sm:$0xff] }
 0x185   : > { %v720_v46 = vpop.f32.mrf.mxu0  ;;  %v791_v47 = vpop.f32.mrf.mxu1 }
 0x186   : > { %v792_v48 = vadd.f32 %v791_v47, %v649_v41  ;;  %796 = vadd.xlane.f32.xlu0 %v719_v44  ;;  %v721_v49 = vadd.f32 %v720_v46, %v578_v40 }
 0x188   : > { %860 = vadd.xlane.f32.xlu1 %v792_v48 }
 0x18a   : > { %818 = vadd.xlane.f32.xlu0 %v721_v49 }
 0x20f   : > { %v797_v50 = vpop.xlane.xlu0 %796 }
 0x210   : > { %v799_v51 = vmul.f32 0.0078125, %v797_v50 }
 0x211   : > { %v861_v36 = vpop.xlane.xlu1 %860 }
 0x212   : > { %v800_v52 = vsub.f32 %v719_v44, %v799_v51  ;;  %v862_v53 = vmul.f32 0.0078125, %v861_v36 }
 0x213   : > { %v819_v54 = vpop.xlane.xlu0 %818 }
 0x214   : > { %v863_v55 = vsub.f32 %v792_v48, %v862_v53  ;;  %v820_v56 = vmul.f32 0.0078125, %v819_v54  ;;  %v801_v57 = vmul.f32 %v800_v52, %v800_v52 }
 0x216   : > { %v821_v58 = vsub.f32 %v721_v49, %v820_v56  ;;  %802 = vadd.xlane.f32.xlu1 %v801_v57  ;;  %v864_v59 = vmul.f32 %v863_v55, %v863_v55 }
 0x218   : > { %v822_v60 = vmul.f32 %v821_v58, %v821_v58 }
 0x21a   : > { %865 = vadd.xlane.f32.xlu1 %v864_v59  ;;  %823 = vadd.xlane.f32.xlu0 %v822_v60 }
 0x21e   : > { %839 = vadd.xlane.f32.xlu0 %v790_v45 }
 0x29f   : > { %v803_v61 = vpop.xlane.xlu1 %802 }
 0x2a0   : > { %v804_v62 = vmul.f32 0.0078125, %v803_v61 }
 0x2a2   : > { %v805_v63 = vadd.f32 1e-05, %v804_v62 }
 0x2a3   : > { %v824_v0 = vpop.xlane.xlu0 %823  ;;  %v866_v4 = vpop.xlane.xlu1 %865 }
 0x2a4   : > { %1248 = vrsqrt.f32 %v805_v63  ;;  %v825_v2 = vmul.f32 0.0078125, %v824_v0  ;;  %v867_v8 = vmul.f32 0.0078125, %v866_v4 }
 0x2a6   : > { %v826_v3 = vadd.f32 1e-05, %v825_v2  ;;  %v868_v13 = vadd.f32 1e-05, %v867_v8  ;;  %v910_v2 = vsub.s32 4, %v1777_v6 }
 0x2a7   : > { %v840_v5 = vpop.xlane.xlu0 %839 }
 0x2a8   : > { %v841_v7 = vmul.f32 0.0078125, %v840_v5  ;;  %1250 = vrsqrt.f32 %v826_v3  ;;  %v911_v4 = vrot.slane %v1783_v12, %v910_v2 }
 0x2a9   : > { %1252 = vrsqrt.f32 %v868_v13 }
 0x2aa   : > { %v842_v9 = vsub.f32 %v790_v45, %v841_v7  ;;  %v916_v7 = vrot.slane %v1785_v14, %v910_v2 }
 0x2ac   : > { %v843_v11 = vmul.f32 %v842_v9, %v842_v9 }
 0x2ae   : > { %844 = vadd.xlane.f32.xlu0 %v843_v11 }
 0x2b1   : > { %v1249_v16 = vpop.eup %1248 }
 0x2b2   : > { %v807_v19 = vmul.f32 %v1249_v16, %v800_v52 }
 0x2b4   : > { %v812_v20 = vmul.f32 %v811_v15, %v807_v19 }
 0x2b5   : > { %v1251_v22 = vpop.eup %1250 }
 0x2b6   : > { %v817_v23 = vadd.f32 %v816_v18, %v812_v20  ;;  %v828_v25 = vmul.f32 %v1251_v22, %v821_v58  ;;  %v1253_v31 = vpop.eup %1252 }
 0x2b7   : > { %v870_v33 = vmul.f32 %v1253_v31, %v863_v55  ;;  %v852_v55 = vsub.s32 2, %v1777_v6 }
 0x2b8   : > { %v1134_v26 = vmul.f32 -1.442695, %v817_v23  ;;  %v833_v27 = vmul.f32 %v832_v21, %v828_v25 }
 0x2b9   : > { %v875_v34 = vmul.f32 %v874_v32, %v870_v33  ;;  %v853_v57 = vrot.slane %v1783_v12, %v852_v55  ;;  %v858_v59 = vrot.slane %v1785_v14, %v852_v55 }
 0x2ba   : > { %1254 = vpow2.f32 %v1134_v26  ;;  %v838_v28 = vadd.f32 %v837_v24, %v833_v27 }
 0x2bb   : > { %v880_v39 = vadd.f32 %v879_v35, %v875_v34 }
 0x2bc   : > { %v1135_v29 = vmul.f32 -1.442695, %v838_v28 }
 0x2be   : > { %1256 = vpow2.f32 %v1135_v29 }
 0x2c7   : > { %v1255_v37 = vpop.eup %1254 }
 0x2c8   : > { %v884_v38 = vadd.f32 1.0, %v1255_v37 }
 0x2ca   : > { %1258 = vrcp.f32 %v884_v38 }
 0x2cb   : > { %v1257_v40 = vpop.eup %1256  ;;  %1260 = vtanh.f32 %v880_v39 }
 0x2cc   : > { %v891_v41 = vadd.f32 1.0, %v1257_v40 }
 0x2ce   : > { %1262 = vrcp.f32 %v891_v41 }
 0x2d7   : > { %v1259_v42 = vpop.eup %1258 }
 0x2d8   : > { %v1261_v44 = vpop.eup %1260  ;;  %v887_v46 = vmul.f32 %v1259_v42, %v408_v43 }
 0x2db   : > { %v1263_v45 = vpop.eup %1262 }
 0x2dc   : > { %v895_v47 = vmul.f32 %v1263_v45, %v1261_v44 }
 0x2de   : > { %v896_v48 = vadd.f32 %v895_v47, %v887_v46 }
 0x2e0   : > { %897 = vadd.xlane.f32.xlu1 %v896_v48 }
 0x337   : > { %v845_v52 = vpop.xlane.xlu0 %844 }
 0x338   : > { %v846_v53 = vmul.f32 0.0078125, %v845_v52 }
 0x33a   : > { %v847_v54 = vadd.f32 1e-05, %v846_v53 }
 0x33c   : > { %1264 = vrsqrt.f32 %v847_v54 }
 0x349   : > { %v1265_v56 = vpop.eup %1264 }
 0x34a   : > { %v849_v58 = vmul.f32 %v1265_v56, %v842_v9 }
 0x34c   : > { %v854_v60 = vmul.f32 %v853_v57, %v849_v58 }
 0x34e   : > { %v859_v61 = vadd.f32 %v858_v59, %v854_v60 }
 0x350   : > { %v1136_v62 = vmul.f32 -1.442695, %v859_v61 }
 0x352   : > { %1266 = vpow2.f32 %v1136_v62 }
 0x35f   : > { %v1267_v3 = vpop.eup %1266 }
 0x360   : > { %v921_v9 = vadd.f32 1.0, %v1267_v3 }
 0x369   : > { %v898_v49 = vpop.xlane.xlu1 %897 }
 0x36a   : > { %v899_v50 = vmul.f32 0.0078125, %v898_v49 }
 0x36c   : > { %v900_v51 = vsub.f32 %v896_v48, %v899_v50 }
 0x36e   : > { %v901_v36 = vmul.f32 %v900_v51, %v900_v51 }
 0x370   : > { %902 = vadd.xlane.f32.xlu1 %v901_v36 }
 0x3f9   : > { %v903_v63 = vpop.xlane.xlu1 %902 }
 0x3fa   : > { %v904_v0 = vmul.f32 0.0078125, %v903_v63 }
 0x3fc   : > { %v905_v1 = vadd.f32 1e-05, %v904_v0 }
 0x3fe   : > { %1268 = vrsqrt.f32 %v905_v1 }
 0x3ff   : > { %1270 = vrcp.f32 %v921_v9 }
 0x40b   : > { %v1269_v5 = vpop.eup %1268 }
 0x40c   : > { %v907_v8 = vmul.f32 %v1269_v5, %v900_v51 }
 0x40e   : > { %v912_v10 = vmul.f32 %v911_v4, %v907_v8 }
 0x410   : > { %v917_v11 = vadd.f32 %v916_v7, %v912_v10 }
 0x412   : > { %927 = vst [vmem:[#allocation3] sm:$0xff] %v917_v11  ;;  %929 = vst [vmem:[%s398_s13] sm:$0xff] %v917_v11  ;;  %1272 = vtanh.f32 %v917_v11 }
 0x413   : > { %1445 = shalt.err (!%p1442_p0)
}
 0x414   : > { %s1446_s13 = scalar_lea.hbm %s1809_s25, 128  ;;  %s1450_s23 = scalar_lea.hbm %s1889_s8, 2048 }
 0x415   : > { %p1447_p2 = scmp.ne.s32.totalorder %s1809_s25, %s1446_s13  ;;  %p1451_p11 = scmp.lt.s32.totalorder %s1809_s25, %s1889_s8 }
 0x416   : > { %p1452_p10 = scmp.lt.s32.totalorder %s1450_s23, %s1446_s13 }
 0x417   : > { %p1448_p5 = pnand %p1447_p2, %p1917_p3 }
 0x418   : > { %p1453_p12 = por %p1452_p10, %p1451_p11 }
 0x419   : > { %p1449_p4 = pneg %p1448_p5 }
 0x41b   : > { %p1454_p13 = pnand %p1453_p12, %p1449_p4 }
 0x41d   : > { %1457 = shalt.err (!%p1454_p13)
}
 0x41e   : > { %1166 = dma.vmem_to_hbm [thread:$0]  (%p1917_p3), %s1811_s26, 128, %s1809_s25, %s936_s22   ;;  %v1271_v6 = vpop.eup %1270 }
 0x41f   : > { %s949_s20 = sshll.u32 %s391_s12, 4  ;;  %v1273_v12 = vpop.eup %1272  ;;  %s1843_s13 = scalar_lea.hbm %s1888_s7, %s1139_s18  ;;  %s950_s20 = int_to_ptr.vmem [resolvable:$true] %s949_s20 }
 0x420   : > { %v925_v13 = vmul.f32 %v1273_v12, %v1271_v6  ;;  %s931_s17 = scalar_lea.sflag [#allocation6], %s1742_s1  ;;  %s1458_s21 = scalar_lea.vmem %s950_s20, 128 }
 0x421   : > { %p1459_p1 = scmp.ne.s32.totalorder %s950_s20, %s1458_s21  ;;  %s1550_s26 = smov [#allocation15]  }
 0x422   : > { %926 = vst [vmem:[#allocation2] sm:$0xff] %v925_v13  ;;  %928 = vst [vmem:[%s391_s12] sm:$0xff] %v925_v13  ;;  %s1462_s25 = sshll.u32 %s1550_s26, 4  ;;  %s1463_s25 = int_to_ptr.vmem [resolvable:$false] %s1462_s25 }
 0x423   : > { %p1460_p8 = pnand %p1459_p1, %p1917_p3  ;;  %s1464_s22 = scalar_lea.vmem %s1463_s25, 256 }
 0x424   : > { %p1465_p9 = scmp.lt.s32.totalorder %s950_s20, %s1463_s25  ;;  %p1466_p6 = scmp.lt.s32.totalorder %s1464_s22, %s1458_s21 }
 0x425   : > { %p1461_p7 = pneg %p1460_p8 }
 0x426   : > { %p1467_p0 = por %p1466_p6, %p1465_p9 }
 0x428   : > { %p1468_p2 = pnand %p1467_p0, %p1461_p7 }
 0x42a   : > { %1471 = shalt.err (!%p1468_p2)
}
 0x42b   : > { %s1472_s11 = scalar_lea.hbm %s1843_s13, 128  ;;  %s1476_s12 = scalar_lea.hbm %s1888_s7, 2048 }
 0x42c   : > { %p1473_p5 = scmp.ne.s32.totalorder %s1843_s13, %s1472_s11  ;;  %p1477_p10 = scmp.lt.s32.totalorder %s1843_s13, %s1888_s7 }
 0x42d   : > { %p1478_p12 = scmp.lt.s32.totalorder %s1476_s12, %s1472_s11 }
 0x42e   : > { %p1474_p4 = pnand %p1473_p5, %p1917_p3 }
 0x42f   : > { %p1479_p13 = por %p1478_p12, %p1477_p10 }
 0x430   : > { %p1475_p11 = pneg %p1474_p4 }
 0x432   : > { %p1480_p1 = pnand %p1479_p13, %p1475_p11 }
 0x434   : > { %1483 = shalt.err (!%p1480_p1)
}
 0x435   : > { %1165 = dma.vmem_to_hbm [thread:$0]  (%p1917_p3), %s950_s20, 128, %s1843_s13, %s931_s17  }
 0x436 PF: > { %p1207_p8 = scmp.ge.s32.totalorder %s1538_s30, 2  ;;  %s974_s24 = sand.u32 1, %s1526_s27  }
 0x437   : > { %p1918_p7 = scmp.ne.s32.totalorder %s1906_s19, 0  ;;  %s975_s16 = scalar_lea.sflag [#allocation6], %s974_s24 }
 0x439   : > { %p1190_p9 = pnand %p1207_p8, %p1918_p7 }
 0x43b   : > { %p1191_p6 = pneg %p1190_p9 }
 0x43d   : > { %1517 = dma.done.wait (%p1191_p6), %s975_s16, 128  }
 0x43e   : > { %1519 = vsyncadd (%p1191_p6), %s975_s16, 4294967168  ;;  %s984_s2 = scalar_lea.sflag [#allocation17], %s974_s24 }
 0x43f   : > { %1521 = dma.done.wait (%p1191_p6), %s984_s2, 128  }
 0x440   : > { %1523 = vsyncadd (%p1191_p6), %s984_s2, 4294967168  ;;  %p28_p3 = scmp.ge.s32.totalorder %s1685_s15, 18   ;;  %s1919_s27 = smov %s1530_s28 }
 0x441   : > { %s1920_s28 = smov %s1534_s29  ;;  %s1921_s29 = smov %s1697_s10 }
 0x442   : > { %s1922_s30 = smov %s1685_s15  ;;  %30 = sbr.rel (!%p28_p3) target bundleno = 14 (0xe), region = 134 }
 0x447   :  { %989 = vsyncpa [#allocation5], 1 }
 0x448   :  { %991 = vsyncpa [#allocation5 + $0x1], 1 }
 0x449   :  { %992 = vsyncpa [#allocation8], 1 }
 0x44a   :  { %993 = vsyncpa [#allocation11], 1 }
 0x44b   :  { %994 = vsyncpa [#allocation14], 1 }
 0x44c   :  { %995 = vsyncpa [#allocation6], 1 }
 0x44d   :  { %997 = vsyncpa [#allocation6 + $0x1], 1 }
 0x44e   :  { %998 = vsyncpa [#allocation17], 1 }
 0x44f   :  { %1000 = vsyncpa [#allocation17 + $0x1], 1 }

</bundles_post_ra>
